<compile_context>
chip_gen: v7x
topology: tpu7x:2x2x1
jax: 0.10.0
libtpu: 0.0.40
codegen_flags: <defaults>
</compile_context>

<pallas_src>
import functools
import math

import jax
import jax.numpy as jnp
import numpy as np
from jax.experimental import pallas as pl
from jax.experimental.pallas import tpu as pltpu

# problem sizes (small, synthetic)
B = 2        # images
N = 16       # detections per image
D = 8        # tag embedding dim

EPS = 1e-6


# ----------------------------- Pallas kernel ---------------------------------
def _tag_wing_kernel(pred_ref, gmask_ref, smask_ref, w_ref, out_ref, *,
                     alpha, beta, wing_c, inv_d, eps):
    pred = pred_ref[...]        # (R, D)   f32, zero-padded rows
    gmask = gmask_ref[...]      # (M, R)   0/1 group membership over detection rows
    smask = smask_ref[...]      # (S, M)   0/1 sub-problem membership over groups
    wvec = w_ref[...]           # (S, 1)   per-sub-problem weight
    m_pad = gmask.shape[0]

    counts = jnp.sum(gmask, axis=1, keepdims=True)          # (M, 1) members per group
    inv_counts = 1.0 / jnp.maximum(counts, 1.0)              # exact divide (review note)

    # Group means ("tags"); unused/padded group rows give zero rows.
    tags = jnp.dot(gmask, pred, preferred_element_type=jnp.float32) * inv_counts   # (M, D)

    # Scatter each group's tag back to its member detections (memberships disjoint batch-wide).
    tag_per_elem = jax.lax.dot_general(
        gmask, tags, (((0,), (0,)), ((), ())),
        preferred_element_type=jnp.float32)                  # (R, D)

    # Wing loss on (member - group mean); non-members are masked by gmask below.
    diff = jnp.abs(pred - tag_per_elem)
    w = jnp.where(diff < alpha, alpha * jnp.log(1.0 + diff / beta), diff - wing_c)  # (R, D)
    w_rowsum = jnp.sum(w, axis=1, keepdims=True)                                    # (R, 1)
    pull_g = (jnp.dot(gmask, w_rowsum, preferred_element_type=jnp.float32)
              * (inv_counts * inv_d))                                               # (M, 1)

    # Whole-step Gram-matrix push term; squared norms come from diag(gram).
    gram = jax.lax.dot_general(
        tags, tags, (((1,), (1,)), ((), ())),
        preferred_element_type=jnp.float32)                  # (M, M)
    ii = jax.lax.broadcasted_iota(jnp.int32, (m_pad, m_pad), 0)
    jj = jax.lax.broadcasted_iota(jnp.int32, (m_pad, m_pad), 1)
    eye = (ii == jj).astype(jnp.float32)
    diag = gram * eye
    sq_col = jnp.sum(diag, axis=1, keepdims=True)            # (M, 1)
    sq_row = jnp.sum(diag, axis=0, keepdims=True)            # (1, M)
    d2 = jnp.maximum(sq_col + sq_row - 2.0 * gram, 0.0)      # clamp f32 cancellation

    # Pair mask: same sub-problem (also encodes validity of both groups), off-diagonal.
    samesp = jax.lax.dot_general(
        smask, smask, (((0,), (0,)), ((), ())),
        preferred_element_type=jnp.float32)                  # (M, M)
    e = jnp.exp(-d2) * ((1.0 - eye) * samesp)
    push_rowsum = jnp.sum(e, axis=1, keepdims=True)          # (M, 1)

    # Vectorised per-sub-problem epilogue.
    num = jnp.sum(smask, axis=1, keepdims=True)                                       # (S, 1)
    push_s = jnp.dot(smask, push_rowsum, preferred_element_type=jnp.float32)          # (S, 1)
    pull_s = jnp.dot(smask, pull_g, preferred_element_type=jnp.float32)               # (S, 1)
    loss_s = push_s * 0.5 / ((num - 1.0) * num + eps) + pull_s / (num + eps)          # (S, 1)

    out_ref[0] = jnp.sum(wvec * loss_s)


@functools.lru_cache(maxsize=None)
def _get_kernel(r_pad, d, m_pad, s_pad, alpha, beta):
    wing_c = alpha - alpha * math.log(1.0 + alpha / beta)
    kernel = functools.partial(
        _tag_wing_kernel, alpha=alpha, beta=beta, wing_c=wing_c,
        inv_d=1.0 / float(d), eps=EPS)
    return pl.pallas_call(
        kernel,
        out_shape=jax.ShapeDtypeStruct((1,), jnp.float32),
        grid=(1,),
        in_specs=[
            pl.BlockSpec((r_pad, d), lambda i: (0, 0)),        # pred rows (block == full array)
            pl.BlockSpec((m_pad, r_pad), lambda i: (0, 0)),    # gmask
            pl.BlockSpec((s_pad, m_pad), lambda i: (0, 0)),    # smask
            pl.BlockSpec((s_pad, 1), lambda i: (0, 0)),        # per-sub-problem weights
        ],
        out_specs=pl.BlockSpec((1,), lambda i: (0,),
                               memory_space=pltpu.MemorySpace.SMEM),
        # Single grid step -> nothing to shard; CORE_PARALLEL would only matter with >=2 steps.
        compiler_params=pltpu.CompilerParams(dimension_semantics=("arbitrary",)),
    )


# ------------------------------- host glue ------------------------------------
def _round8(x):
    return max(8, ((int(x) + 7) // 8) * 8)


def _build_masks(gt_np, anchor_np, group_anchor):
    """Data-dependent grouping (host side, mirrors gen_group_inds in the reference)."""
    b, n = gt_np.shape
    if not group_anchor:
        anchor_np = np.zeros_like(anchor_np)

    groups = []        # list of global detection-row index arrays (one per gt group)
    sub_groups = []    # list of (image idx, [group ids]) per (image, anchor-group)
    anchor_counts = np.zeros((b,), np.float64)
    for i in range(b):
        avals = np.unique(anchor_np[i])
        anchor_counts[i] = len(avals)
        for av in avals:
            sel = np.where(anchor_np[i] == av)[0]
            sub_gt = gt_np[i][sel]
            uniq = np.unique(sub_gt)
            if len(uniq) == 1:
                # single_tag_loss early-returns 0 for this sub-problem
                continue
            gids = []
            for g in uniq:
                if g == -1:
                    continue
                gids.append(len(groups))
                groups.append(sel[sub_gt == g] + i * n)
            sub_groups.append((i, gids))

    r_pad = _round8(b * n)
    m_pad = _round8(max(len(groups), 1))
    s_pad = _round8(max(len(sub_groups), 1))

    gmask = np.zeros((m_pad, r_pad), np.float32)
    for gi, members in enumerate(groups):
        gmask[gi, members] = 1.0
    smask = np.zeros((s_pad, m_pad), np.float32)
    wvec = np.zeros((s_pad, 1), np.float32)
    for si, (img, gids) in enumerate(sub_groups):
        smask[si, gids] = 1.0
        wvec[si, 0] = 1.0 / (anchor_counts[img] * b)   # folds the per-image and per-batch means
    return gmask, smask, wvec, r_pad


class TagWingLossPallas:
    def __init__(self, reduction='mean', loss_weight=1.0, group_anchor=True,
                 alpha=10, beta=2):
        self.reduction = reduction
        self.loss_weight = loss_weight
        self.group_anchor = group_anchor
        self.alpha = float(alpha)
        self.beta = float(beta)
        self._mask_cache = {}
        # TODO(synk): weight / avg_factor / reduction_override of @weighted_loss are a no-op
        # for this scalar loss with default args (weight=None, avg_factor=None); not modelled.

    def __call__(self, pred, gt_inds, anchor_inds):
        gt_np = np.asarray(gt_inds)
        anchor_np = np.asarray(anchor_inds)
        b, n, d = pred.shape

        key = (gt_np.tobytes(), anchor_np.tobytes(), gt_np.shape, self.group_anchor)
        cached = self._mask_cache.get(key)
        if cached is None:
            gmask, smask, wvec, r_pad = _build_masks(gt_np, anchor_np, self.group_anchor)
            cached = (jnp.asarray(gmask), jnp.asarray(smask), jnp.asarray(wvec), r_pad)
            self._mask_cache[key] = cached
        gmask, smask, wvec, r_pad = cached

        # pred stays on device (no host round-trip); just flatten (and pad rows if needed).
        pred_rows = jnp.reshape(jnp.asarray(pred, jnp.float32), (b * n, d))
        if r_pad > b * n:
            pred_rows = jnp.pad(pred_rows, ((0, r_pad - b * n), (0, 0)))

        fn = _get_kernel(r_pad, d, int(gmask.shape[0]), int(smask.shape[0]),
                         self.alpha, self.beta)
        loss = fn(pred_rows, gmask, smask, wvec)[0]
        return self.loss_weight * loss


# --------------------------- numpy reference ----------------------------------
def _wing_loss_ref(diff, alpha, beta):
    c = alpha - alpha * math.log(1.0 + alpha / beta)
    da = np.abs(diff).reshape(-1)
    loss = np.where(da < alpha, alpha * np.log(1.0 + da / beta), da - c)
    return loss.mean()


def _single_tag_loss_ref(pred, gt, alpha, beta):
    uniq = np.unique(gt)
    if len(uniq) == 1:
        return 0.0
    eps = 1e-6
    tags, pull = [], 0.0
    for g in uniq:
        if g == -1:
            continue
        group = pred[gt == g]
        t = group.mean(axis=0)
        tags.append(t)
        pull += _wing_loss_ref(group - t[None, :], alpha, beta)
    tags = np.stack(tags)
    num = tags.shape[0]
    d2 = ((tags[:, None, :] - tags[None, :, :]) ** 2).sum(-1)
    push = np.exp(-d2).sum() - num
    push = push / ((num - 1) * num + eps) * 0.5
    pull = pull / (num + eps)
    return push + pull


def _tag_wing_loss_ref(pred, gt_inds, anchor_inds, group_anchor, alpha, beta):
    img_num = len(gt_inds)
    loss = 0.0
    for p, g, a in zip(pred, gt_inds, anchor_inds):
        if group_anchor:
            sub = 0.0
            avals = np.unique(a)
            for av in avals:
                sel = np.where(a == av)[0]
                sub += _single_tag_loss_ref(p[sel], g[sel], alpha, beta)
            sub /= len(avals)
        else:
            sub = _single_tag_loss_ref(p, g, alpha, beta)
        loss += sub
    return loss / img_num


# ----------------------------------- main --------------------------------------
if __name__ == "__main__":
    key = jax.random.PRNGKey(0)
    pred = jax.random.normal(key, (B, N, D), dtype=jnp.float32)

    gt_inds = np.array([
        [0, 0, 0, 1, 1, 2, 2, -1, 3, 3, 4, 4, 4, -1, -1, 3],
        [5, 5, 5, 5, 5, 5, 5, 5, 0, 1, 0, 1, 2, 2, -1, 0],
    ], dtype=np.int32)
    anchor_inds = np.array([
        [0] * 8 + [1] * 8,
        [0] * 8 + [1] * 8,
    ], dtype=np.int32)

    module = TagWingLossPallas(reduction='mean', loss_weight=1.0,
                               group_anchor=True, alpha=10, beta=2)
    loss = module(pred, gt_inds, anchor_inds)
    loss = jax.block_until_ready(loss)

    ref = _tag_wing_loss_ref(np.asarray(pred, np.float64), gt_inds, anchor_inds,
                             group_anchor=True, alpha=10.0, beta=2.0)
    assert np.allclose(float(loss), ref, rtol=2e-3, atol=1e-5), (float(loss), ref)
    print("KERNEL_OK")
</pallas_src>

<mosaic_0001>
module attributes {stable_mosaic.version = 11 : i64} {
  func.func @_tag_wing_kernel(%arg0: i32, %arg1: memref<32x8xf32, #tpu.memory_space<vmem>>, %arg2: memref<8x32xf32, #tpu.memory_space<vmem>>, %arg3: memref<8x8xf32, #tpu.memory_space<vmem>>, %arg4: memref<8x1xf32, #tpu.memory_space<vmem>>, %arg5: memref<1xf32, #tpu.memory_space<smem>>) attributes {dimension_semantics = [#tpu.dimension_semantics<arbitrary>], iteration_bounds = array<i64: 1>, scalar_prefetch = 0 : i64, scratch_operands = 0 : i64, tpu.core_type = #tpu.core_type<tc>, window_params = [{pipeline_mode = #tpu.pipeline_mode<synchronous>, transform_indices = @transform_0, window_bounds = array<i64: 32, 8>}, {pipeline_mode = #tpu.pipeline_mode<synchronous>, transform_indices = @transform_1, window_bounds = array<i64: 8, 32>}, {pipeline_mode = #tpu.pipeline_mode<synchronous>, transform_indices = @transform_2, window_bounds = array<i64: 8, 8>}, {pipeline_mode = #tpu.pipeline_mode<synchronous>, transform_indices = @transform_3, window_bounds = array<i64: 8, 1>}, {transform_indices = @transform_4, window_bounds = array<i64: 1>}]} {
    %c0 = arith.constant 0 : index
    %c0_0 = arith.constant 0 : index
    %0 = vector.load %arg1[%c0, %c0_0] : memref<32x8xf32, #tpu.memory_space<vmem>>, vector<32x8xf32>
    %c0_1 = arith.constant 0 : index
    %c0_2 = arith.constant 0 : index
    %1 = vector.load %arg2[%c0_1, %c0_2] : memref<8x32xf32, #tpu.memory_space<vmem>>, vector<8x32xf32>
    %c0_3 = arith.constant 0 : index
    %c0_4 = arith.constant 0 : index
    %2 = vector.load %arg3[%c0_3, %c0_4] : memref<8x8xf32, #tpu.memory_space<vmem>>, vector<8x8xf32>
    %c0_5 = arith.constant 0 : index
    %c0_6 = arith.constant 0 : index
    %3 = vector.load %arg4[%c0_5, %c0_6] : memref<8x1xf32, #tpu.memory_space<vmem>>, vector<8x1xf32>
    %cst = arith.constant dense<0.000000e+00> : vector<8xf32>
    %4 = vector.multi_reduction <add>, %1, %cst [1] : vector<8x32xf32> to vector<8xf32>
    %5 = vector.shape_cast %4 : vector<8xf32> to vector<8x1xf32>
    %cst_7 = arith.constant 1.000000e+00 : f32
    %6 = vector.broadcast %cst_7 : f32 to vector<8x1xf32>
    %7 = arith.maximumf %5, %6 : vector<8x1xf32>
    %cst_8 = arith.constant 1.000000e+00 : f32
    %8 = vector.broadcast %cst_8 : f32 to vector<8x1xf32>
    %9 = arith.divf %8, %7 : vector<8x1xf32>
    %cst_9 = arith.constant dense<0.000000e+00> : vector<8x8xf32>
    %10 = tpu.matmul %1, %0, %cst_9 {dimension_numbers = #tpu.dot_dimension_numbers<[1], [0], [0], [1], [0, 0, 1, 1], [], []>} : vector<8x32xf32>, vector<32x8xf32>, vector<8x8xf32> -> vector<8x8xf32>
    %11 = vector.broadcast %9 : vector<8x1xf32> to vector<8x8xf32>
    %12 = arith.mulf %10, %11 : vector<8x8xf32>
    %cst_10 = arith.constant dense<0.000000e+00> : vector<32x8xf32>
    %13 = tpu.matmul %1, %12, %cst_10 {dimension_numbers = #tpu.dot_dimension_numbers<[0], [0], [1], [1], [0, 1, 1, 1], [], []>} : vector<8x32xf32>, vector<8x8xf32>, vector<32x8xf32> -> vector<32x8xf32>
    %14 = arith.subf %0, %13 : vector<32x8xf32>
    %15 = math.absf %14 : vector<32x8xf32>
    %cst_11 = arith.constant 1.000000e+01 : f32
    %16 = vector.broadcast %cst_11 : f32 to vector<32x8xf32>
    %17 = arith.cmpf olt, %15, %16 : vector<32x8xf32>
    %cst_12 = arith.constant 2.000000e+00 : f32
    %18 = vector.broadcast %cst_12 : f32 to vector<32x8xf32>
    %19 = arith.divf %15, %18 : vector<32x8xf32>
    %cst_13 = arith.constant 1.000000e+00 : f32
    %20 = vector.broadcast %cst_13 : f32 to vector<32x8xf32>
    %21 = arith.addf %20, %19 : vector<32x8xf32>
    %22 = math.log %21 : vector<32x8xf32>
    %cst_14 = arith.constant 1.000000e+01 : f32
    %23 = vector.broadcast %cst_14 : f32 to vector<32x8xf32>
    %24 = arith.mulf %23, %22 : vector<32x8xf32>
    %cst_15 = arith.constant -7.9175949 : f32
    %25 = vector.broadcast %cst_15 : f32 to vector<32x8xf32>
    %26 = arith.subf %15, %25 : vector<32x8xf32>
    %27 = arith.select %17, %24, %26 : vector<32x8xi1>, vector<32x8xf32>
    %cst_16 = arith.constant dense<0.000000e+00> : vector<32xf32>
    %28 = vector.multi_reduction <add>, %27, %cst_16 [1] : vector<32x8xf32> to vector<32xf32>
    %29 = vector.shape_cast %28 : vector<32xf32> to vector<32x1xf32>
    %cst_17 = arith.constant dense<0.000000e+00> : vector<8x1xf32>
    %30 = tpu.matmul %1, %29, %cst_17 {dimension_numbers = #tpu.dot_dimension_numbers<[1], [0], [0], [1], [0, 0, 1, 1], [], []>} : vector<8x32xf32>, vector<32x1xf32>, vector<8x1xf32> -> vector<8x1xf32>
    %cst_18 = arith.constant 1.250000e-01 : f32
    %31 = vector.broadcast %cst_18 : f32 to vector<8x1xf32>
    %32 = arith.mulf %9, %31 : vector<8x1xf32>
    %33 = arith.mulf %30, %32 : vector<8x1xf32>
    %cst_19 = arith.constant dense<0.000000e+00> : vector<8x8xf32>
    %34 = tpu.matmul %12, %12, %cst_19 {dimension_numbers = #tpu.dot_dimension_numbers<[1], [1], [0], [0], [0, 0, 1, 0], [], []>} : vector<8x8xf32>, vector<8x8xf32>, vector<8x8xf32> -> vector<8x8xf32>
    %35 = tpu.iota {dimensions = array<i32: 0>} : vector<8x8xi32>
    %36 = tpu.iota {dimensions = array<i32: 1>} : vector<8x8xi32>
    %37 = arith.cmpi eq, %35, %36 : vector<8x8xi32>
    %38 = arith.extui %37 : vector<8x8xi1> to vector<8x8xi32>
    %39 = arith.sitofp %38 : vector<8x8xi32> to vector<8x8xf32>
    %40 = arith.mulf %34, %39 : vector<8x8xf32>
    %cst_20 = arith.constant dense<0.000000e+00> : vector<8xf32>
    %41 = vector.multi_reduction <add>, %40, %cst_20 [1] : vector<8x8xf32> to vector<8xf32>
    %42 = vector.shape_cast %41 : vector<8xf32> to vector<8x1xf32>
    %cst_21 = arith.constant dense<0.000000e+00> : vector<8xf32>
    %43 = vector.multi_reduction <add>, %40, %cst_21 [0] : vector<8x8xf32> to vector<8xf32>
    %44 = vector.shape_cast %43 : vector<8xf32> to vector<1x8xf32>
    %45 = vector.broadcast %42 : vector<8x1xf32> to vector<8x8xf32>
    %46 = vector.broadcast %44 : vector<1x8xf32> to vector<8x8xf32>
    %47 = arith.addf %45, %46 : vector<8x8xf32>
    %cst_22 = arith.constant 2.000000e+00 : f32
    %48 = vector.broadcast %cst_22 : f32 to vector<8x8xf32>
    %49 = arith.mulf %48, %34 : vector<8x8xf32>
    %50 = arith.subf %47, %49 : vector<8x8xf32>
    %cst_23 = arith.constant 0.000000e+00 : f32
    %51 = vector.broadcast %cst_23 : f32 to vector<8x8xf32>
    %52 = arith.maximumf %50, %51 : vector<8x8xf32>
    %cst_24 = arith.constant dense<0.000000e+00> : vector<8x8xf32>
    %53 = tpu.matmul %2, %2, %cst_24 {dimension_numbers = #tpu.dot_dimension_numbers<[0], [0], [1], [1], [0, 1, 1, 1], [], []>} : vector<8x8xf32>, vector<8x8xf32>, vector<8x8xf32> -> vector<8x8xf32>
    %cst_25 = arith.constant 0.000000e+00 : f32
    %54 = vector.broadcast %cst_25 : f32 to vector<8x8xf32>
    %55 = arith.subf %54, %52 : vector<8x8xf32>
    %56 = math.exp %55 : vector<8x8xf32>
    %cst_26 = arith.constant 1.000000e+00 : f32
    %57 = vector.broadcast %cst_26 : f32 to vector<8x8xf32>
    %58 = arith.subf %57, %39 : vector<8x8xf32>
    %59 = arith.mulf %58, %53 : vector<8x8xf32>
    %60 = arith.mulf %56, %59 : vector<8x8xf32>
    %cst_27 = arith.constant dense<0.000000e+00> : vector<8xf32>
    %61 = vector.multi_reduction <add>, %60, %cst_27 [1] : vector<8x8xf32> to vector<8xf32>
    %62 = vector.shape_cast %61 : vector<8xf32> to vector<8x1xf32>
    %cst_28 = arith.constant dense<0.000000e+00> : vector<8xf32>
    %63 = vector.multi_reduction <add>, %2, %cst_28 [1] : vector<8x8xf32> to vector<8xf32>
    %64 = vector.shape_cast %63 : vector<8xf32> to vector<8x1xf32>
    %cst_29 = arith.constant dense<0.000000e+00> : vector<8x1xf32>
    %65 = tpu.matmul %2, %62, %cst_29 {dimension_numbers = #tpu.dot_dimension_numbers<[1], [0], [0], [1], [0, 0, 1, 1], [], []>} : vector<8x8xf32>, vector<8x1xf32>, vector<8x1xf32> -> vector<8x1xf32>
    %cst_30 = arith.constant dense<0.000000e+00> : vector<8x1xf32>
    %66 = tpu.matmul %2, %33, %cst_30 {dimension_numbers = #tpu.dot_dimension_numbers<[1], [0], [0], [1], [0, 0, 1, 1], [], []>} : vector<8x8xf32>, vector<8x1xf32>, vector<8x1xf32> -> vector<8x1xf32>
    %cst_31 = arith.constant 5.000000e-01 : f32
    %67 = vector.broadcast %cst_31 : f32 to vector<8x1xf32>
    %68 = arith.mulf %65, %67 : vector<8x1xf32>
    %cst_32 = arith.constant 1.000000e+00 : f32
    %69 = vector.broadcast %cst_32 : f32 to vector<8x1xf32>
    %70 = arith.subf %64, %69 : vector<8x1xf32>
    %71 = arith.mulf %70, %64 : vector<8x1xf32>
    %cst_33 = arith.constant 9.99999997E-7 : f32
    %72 = vector.broadcast %cst_33 : f32 to vector<8x1xf32>
    %73 = arith.addf %71, %72 : vector<8x1xf32>
    %74 = arith.divf %68, %73 : vector<8x1xf32>
    %cst_34 = arith.constant 9.99999997E-7 : f32
    %75 = vector.broadcast %cst_34 : f32 to vector<8x1xf32>
    %76 = arith.addf %64, %75 : vector<8x1xf32>
    %77 = arith.divf %66, %76 : vector<8x1xf32>
    %78 = arith.addf %74, %77 : vector<8x1xf32>
    %79 = arith.mulf %3, %78 : vector<8x1xf32>
    %80 = vector.shape_cast %79 : vector<8x1xf32> to vector<1x8x1xf32>
    %cst_35 = arith.constant dense<0.000000e+00> : vector<1xf32>
    %81 = vector.multi_reduction <add>, %80, %cst_35 [1, 2] : vector<1x8x1xf32> to vector<1xf32>
    %82 = vector.shape_cast %81 : vector<1xf32> to vector<1x1x1xf32>
    %83 = vector.extract %82[0, 0, 0] : f32 from vector<1x1x1xf32>
    %c0_36 = arith.constant 0 : index
    %84 = memref.load %arg5[%c0_36] : memref<1xf32, #tpu.memory_space<smem>>
    memref.store %83, %arg5[%c0_36] : memref<1xf32, #tpu.memory_space<smem>>
    return
  }
  func.func @transform_0(%arg0: i32) -> (i32, i32) {
    %c0_i32 = arith.constant 0 : i32
    %c0_i32_0 = arith.constant 0 : i32
    %c0_i32_1 = arith.constant 0 : i32
    return %c0_i32, %c0_i32_0 : i32, i32
  }
  func.func @transform_1(%arg0: i32) -> (i32, i32) {
    %c0_i32 = arith.constant 0 : i32
    %c0_i32_0 = arith.constant 0 : i32
    %c0_i32_1 = arith.constant 0 : i32
    return %c0_i32, %c0_i32_0 : i32, i32
  }
  func.func @transform_2(%arg0: i32) -> (i32, i32) {
    %c0_i32 = arith.constant 0 : i32
    %c0_i32_0 = arith.constant 0 : i32
    %c0_i32_1 = arith.constant 0 : i32
    return %c0_i32, %c0_i32_0 : i32, i32
  }
  func.func @transform_3(%arg0: i32) -> (i32, i32) {
    %c0_i32 = arith.constant 0 : i32
    %c0_i32_0 = arith.constant 0 : i32
    %c0_i32_1 = arith.constant 0 : i32
    return %c0_i32, %c0_i32_0 : i32, i32
  }
  func.func @transform_4(%arg0: i32) -> i32 {
    %c0_i32 = arith.constant 0 : i32
    %c0_i32_0 = arith.constant 0 : i32
    return %c0_i32 : i32
  }
}

</mosaic_0001>

<bundles_post_ra>
// kernel: tpu_custom_call.1
= control target key start
LH: loop header
LB: loop body
LE: loop exit
PB: predicated region body
PF: predicated region fallthrough
CT: control target
= control target key end

     0   :  { %v888_v3 = vmov 0.0|0.0   ;;  %vm889_vm0 = vmmov 0   ;;  %v890_v6 = vmov 0.0   ;;  %vm25_vm1 = vcmask 261120   ;;  %s1016_s0 = inlined_call_operand.vmem [shape: f32[32,8], index: 0, kind: input, shape index: {}]   ;;  %s1017_s1 = inlined_call_operand.vmem [shape: f32[8,32], index: 1, kind: input, shape index: {}]   ;;  %s1018_s2 = inlined_call_operand.vmem [shape: f32[8,8], index: 2, kind: input, shape index: {}]   ;;  %s1019_s3 = inlined_call_operand.vmem [shape: f32[8,1], index: 3, kind: input, shape index: {}]   ;;  %s1020_s4 = inlined_call_operand.hbm [shape: f32[1], index: 4, kind: output, shape index: {}]  }
   0x1   :  { %v18_v0 = vld [vmem:[%s1016_s0] sm:$0xff]  ;;  %v19_v1 = vld [vmem:[%s1016_s0 + $0x8] sm:$0xff]  ;;  %v926_v2 = vld [vmem:[%s1016_s0 + $0x10] sm:$0xff]  ;;  %842 = vmatprep.subr.bf16.mxu0 %v888_v3  ;;  %800 = vmatprep.mubr.msk.f32.mxu0 %vm889_vm0, %v890_v6 }
   0x2   :  { %v843_v4 = vpack.c.bf16 %v19_v1, %v18_v0  ;;  %v932_v5 = vld [vmem:[%s1016_s0 + $0x18] sm:$0xff]  ;;  %v939_v7 = vld [vmem:[%s1017_s1] sm:$0xff] }
   0x3   :  { %9 = vsyncpa [#allocation3], 0  ;;  %v26_v8 = vsel %vm25_vm1, %v939_v7, 0.0  ;;  %v846_v9 = vpack.c.bf16 %v932_v5, %v926_v2  ;;  %vm138_vm2 = vcmask 64512   ;;  %v434_v20 = vlaneseq  ;;  %s876_s29 = scalar_lea.hbm %s1020_s4, 16 }
   0x4   :  { %844 = vmatpush3.bf16.msra.mxu0 %v843_v4  ;;  %27 = vadd.xlane.f32.xlu0 %v26_v8  ;;  %vm726_vm8 = vcmask 7168   ;;  %p877_p0 = scmp.ne.s32.totalorder %s1020_s4, %s876_s29  ;;  %p880_p1 = scmp.lt.u32.totalorder %s876_s29, %s1020_s4 }
   0x5   :  { %845 = vmatprep.subr.bf16.mxu0 %v888_v3  ;;  %v435_v21 = vshrl.u32 %v434_v20, 7  ;;  %v437_v22 = vand.u32 127, %v434_v20 }
   0x6   :  { %p882_p2 = pnand %p880_p1, %p877_p0 }
   0x7   :  { %vm438_vm3 = vcmp.eq.s32.totalorder %v435_v21, %v437_v22 }
   0x8   :  { %847 = vmatpush3.bf16.msra.mxu0 %v846_v9  ;;  %v968_v23 = vsel %vm438_vm3, 1.0, %v890_v6 }
   0x9   :  { %822 = vmatprep.subr.mxu0 %v890_v6 }
   0xb   :  { %801 = vmatmul.mubr.msk.f32.vlgmr.msra.gmra.mrb[0].mxu0 %vm25_vm1, %v939_v7 }
   0xc   :  { %824 = vmatprep.mubr.msk.f32.mxu0 %vm889_vm0, %v890_v6 }
  0x31   :  { %106 = vxpose.xlu0.b32.start.end [1/1] (short) (narrow) %v939_v7, 32 }
  0x91   :  { %v28_v10 = vpop.xlane.xlu0 %27 }
  0x92   :  { %v29_v12 = vmax.f32 %v28_v10, 1.0 }
  0x94   :  { %860 = vrcp.f32 %v29_v12 }
  0x9e   :  { %v953_v14 = vpop.eup %860 }
  0xb1   :  { %v122_v11 = vpop.trf.xlu0 }
  0xb2   :  { %805 = vmatprep.mubr.msk.f32.mxu1 %vm138_vm2, %v122_v11  ;;  %v23_v11 = vld [vmem:[%s1018_s2] sm:$0xff] }
  0xb5   :  { %v123_v13 = vpop.trf.xlu0 }
  0xb9   :  { %v124_v16 = vpop.trf.xlu0 }
  0xbd   :  { %v125_v19 = vpop.trf.xlu0 }
  0xde   :  { %v101_v15 = vpop.f32.mrb[0].mxu0 }
  0xdf   :  { %v105_v17 = vmul.f32 %v953_v14, %v101_v15  ;;  %v802_v18 = vpop.f32.mrb[1].mxu0 }
  0xe1   :  { %803 = vmatprep.subr.mxu1 %v105_v17  ;;  %823 = vmatpush3.xpose.msk.msra.mxu0 %vm138_vm2, %v105_v17 }
  0xe2   :  { %804 = vmatpush3.msra.mxu1 %v105_v17  ;;  %832 = vmatprep.subr.mxu0 %v890_v6 }
  0xe3   :  { %806 = vmatmul.mubr.msk.f32.vlgmr.msra.gmra.mrb[0].mxu1 %vm138_vm2, %v123_v13  ;;  %848 = vmatprep.subr.bf16.mxu1 %v888_v3 }
  0xe4   :  { %825 = vmatmul.mubr.msk.f32.vlgmr.msra.gmra.mrb[2].mxu0 %vm138_vm2, %v105_v17  ;;  %808 = vmatprep.mubr.msk.f32.mxu1 %vm138_vm2, %v124_v16 }
  0xe5   :  { %834 = vmatprep.mubr.msk.f32.mxu0 %vm889_vm0, %v890_v6 }
  0xe7   :  { %809 = vmatmul.mubr.msk.f32.gmra.mrb[2].mxu1 %vm138_vm2, %v125_v19 }
  0xe8   :  { %819 = vmatprep.mubr.msk.f32.mxu1 %vm889_vm0, %v890_v6 }
 0x1b6   :  { %v807_v24 = vpop.f32.mrb[0].mxu1 }
 0x1b7   :  { %v237_v25 = vsub.f32 %v19_v1, %v807_v24  ;;  %v217_v26 = vpop.f32.mrb[1].mxu1  ;;  %v970_v27 = vpop.f32.mrb[2].mxu0 }
 0x1b8   :  { %v236_v28 = vsub.f32 %v18_v0, %v217_v26  ;;  %v441_v29 = vmul.f32 %v968_v23, %v970_v27  ;;  %v826_v30 = vpop.f32.mrb[3].mxu0  ;;  %v452_v20 = vmul.f32 2.0, %v970_v27 }
 0x1b9   :  { %v241_v31 = vand.u32 2147483647, %v237_v25 }
 0x1ba   :  { %v240_v32 = vand.u32 2147483647, %v236_v28  ;;  %v810_v33 = vpop.f32.mrb[2].mxu1  ;;  %v442_v34 = vsel %vm138_vm2, %v441_v29, 0.0 }
 0x1bb   :  { %v250_v35 = vmul.f32 0.5, %v241_v31  ;;  %v239_v36 = vsub.f32 %v932_v5, %v810_v33  ;;  %v227_v37 = vpop.f32.mrb[3].mxu1  ;;  %443 = vadd.xlane.f32.xlu0 %v442_v34  ;;  %v758_v53 = vadd.f32 7.917595, %v241_v31  ;;  %vm245_vm4 = vcmp.lt.f32.partialorder %v241_v31, 10.0 }
 0x1bc   :  { %v249_v38 = vmul.f32 0.5, %v240_v32  ;;  %v238_v39 = vsub.f32 %v926_v2, %v227_v37  ;;  %v757_v57 = vadd.f32 7.917595, %v240_v32  ;;  %vm244_vm5 = vcmp.lt.f32.partialorder %v240_v32, 10.0 }
 0x1bd   :  { %v254_v40 = vadd.f32 1.0, %v250_v35  ;;  %v243_v41 = vand.u32 2147483647, %v239_v36  ;;  %v445_v12 = vrot.slane %v442_v34, 4  ;;  %v563_v36 = vsub.f32 1.0, %v968_v23 }
 0x1be   :  { %v253_v42 = vadd.f32 1.0, %v249_v38  ;;  %v242_v43 = vand.u32 2147483647, %v238_v39 }
 0x1bf   :  { %862 = vlog2.f32 %v254_v40  ;;  %v252_v44 = vmul.f32 0.5, %v243_v41  ;;  %v760_v0 = vadd.f32 7.917595, %v243_v41  ;;  %vm247_vm6 = vcmp.lt.f32.partialorder %v243_v41, 10.0 }
 0x1c0   :  { %864 = vlog2.f32 %v253_v42  ;;  %v251_v45 = vmul.f32 0.5, %v242_v43  ;;  %v759_v5 = vadd.f32 7.917595, %v242_v43  ;;  %vm246_vm7 = vcmp.lt.f32.partialorder %v242_v43, 10.0 }
 0x1c1   :  { %v256_v46 = vadd.f32 1.0, %v252_v44  ;;  %v446_v13 = vadd.f32 %v445_v12, %v442_v34 }
 0x1c2   :  { %v255_v47 = vadd.f32 1.0, %v251_v45 }
 0x1c3   :  { %866 = vlog2.f32 %v256_v46  ;;  %v447_v15 = vrot.slane %v446_v13, 2 }
 0x1c4   :  { %868 = vlog2.f32 %v255_v47 }
 0x1c5   :  { %v448_v16 = vadd.f32 %v447_v15, %v446_v13 }
 0x1c7   :  { %v449_v17 = vrot.slane %v448_v16, 1 }
 0x1c9   :  { %v863_v48 = vpop.eup %862  ;;  %v450_v18 = vadd.f32 %v449_v17, %v448_v16 }
 0x1ca   :  { %v865_v49 = vpop.eup %864  ;;  %v260_v50 = vmul.f32 0.6931472, %v863_v48 }
 0x1cb   :  { %v258_v51 = vmul.f32 0.6931472, %v865_v49 }
 0x1cc   :  { %v266_v52 = vmul.f32 10.0, %v260_v50 }
 0x1cd   :  { %v867_v54 = vpop.eup %866  ;;  %v265_v55 = vmul.f32 10.0, %v258_v51 }
 0x1ce   :  { %v869_v56 = vpop.eup %868  ;;  %v274_v58 = vsel %vm245_vm4, %v266_v52, %v758_v53  ;;  %v264_v59 = vmul.f32 0.6931472, %v867_v54 }
 0x1cf   :  { %v280_v60 = vsel %vm138_vm2, %v274_v58, 0.0  ;;  %v273_v61 = vsel %vm244_vm5, %v265_v55, %v757_v57  ;;  %v262_v63 = vmul.f32 0.6931472, %v869_v56  ;;  %v24_v56 = vld [vmem:[%s1019_s3] sm:$0xff] }
 0x1d0   :  { %281 = vadd.xlane.f32.xlu1 %v280_v60  ;;  %v268_v62 = vmul.f32 10.0, %v264_v59  ;;  %v277_v1 = vsel %vm138_vm2, %v273_v61, 0.0 }
 0x1d1   :  { %v267_v4 = vmul.f32 10.0, %v262_v63 }
 0x1d2   :  { %v276_v2 = vsel %vm247_vm6, %v268_v62, %v760_v0 }
 0x1d3   :  { %v286_v8 = vsel %vm138_vm2, %v276_v2, 0.0  ;;  %v275_v9 = vsel %vm246_vm7, %v267_v4, %v759_v5 }
 0x1d4   :  { %278 = vadd.xlane.f32.xlu1 %v277_v1  ;;  %v283_v10 = vsel %vm138_vm2, %v275_v9, 0.0 }
 0x1d8   :  { %287 = vadd.xlane.f32.xlu1 %v286_v8 }
 0x1dc   :  { %284 = vadd.xlane.f32.xlu1 %v283_v10 }
 0x20f   :  { %455 = vxpose.xlu1.b32.start.end [1/1] (short) (narrow) %v23_v11, 8 }
 0x248   :  { %v444_v19 = vpop.xlane.xlu0 %443 }
 0x249   :  { %v451_v21 = vadd.f32 %v450_v18, %v444_v19 }
 0x24b   :  { %v453_v22 = vsub.f32 %v451_v21, %v452_v20 }
 0x25d   :  { %v282_v24 = vpop.xlane.xlu1 %281 }
 0x261   :  { %v279_v25 = vpop.xlane.xlu1 %278 }
 0x262   :  { %v849_v26 = vpack.c.bf16 %v282_v24, %v279_v25 }
 0x264   :  { %850 = vmatpush3.bf16.msra.mxu1 %v849_v26 }
 0x265   :  { %v288_v28 = vpop.xlane.xlu1 %287  ;;  %851 = vmatprep.subr.bf16.mxu1 %v888_v3  ;;  %v359_v3 = vmul.f32 0.125, %v953_v14  ;;  %v569_v14 = vsel %vm138_vm2, %v23_v11, 0.0 }
 0x266   :  { %570 = vadd.xlane.f32.xlu0 %v569_v14 }
 0x269   :  { %v285_v29 = vpop.xlane.xlu1 %284 }
 0x26a   :  { %v852_v30 = vpack.c.bf16 %v288_v28, %v285_v29 }
 0x26c   :  { %853 = vmatpush3.bf16.msra.mxu1 %v852_v30 }
 0x26d   :  { %827 = vmatprep.subr.mxu1 %v890_v6 }
 0x26f   :  { %820 = vmatmul.mubr.msk.f32.vlgmr.msra.gmra.mrb[4].mxu1 %vm25_vm1, %v939_v7  ;;  %v454_v7 = vmax.f32 %v453_v22, 0.0 }
 0x270   :  { %828 = vmatpush3.msra.mxu1 %v23_v11  ;;  %829 = vmatprep.mubr.msk.f32.mxu1 %vm889_vm0, %v890_v6 }
 0x271   :  { %837 = vmatprep.subr.mxu1 %v890_v6  ;;  %v560_v34 = vsub.f32 0.0, %v454_v7 }
 0x273   :  { %v561_v35 = vmul.f32 1.442695, %v560_v34 }
 0x275   :  { %870 = vpow2.f32 %v561_v35 }
 0x27f   :  { %v871_v40 = vpop.eup %870 }
 0x28f   :  { %v471_v27 = vpop.trf.xlu1 }
 0x290   :  { %830 = vmatmul.mubr.msk.f32.vlgmr.msra.gmra.mrb[6].mxu1 %vm138_vm2, %v471_v27 }
 0x291   :  { %839 = vmatprep.mubr.msk.f32.mxu1 %vm889_vm0, %v890_v6 }
 0x2f3   :  { %v571_v45 = vpop.xlane.xlu0 %570 }
 0x2f4   :  { %v768_v46 = vadd.f32 -1.0, %v571_v45  ;;  %v721_v47 = vadd.f32 1e-06, %v571_v45 }
 0x2f6   :  { %v717_v23 = vmul.f32 %v768_v46, %v571_v45  ;;  %872 = vrcp.f32 %v721_v47 }
 0x2f8   :  { %v718_v48 = vadd.f32 1e-06, %v717_v23 }
 0x2fa   :  { %874 = vrcp.f32 %v718_v48 }
 0x300   :  { %v873_v49 = vpop.eup %872 }
 0x304   :  { %v875_v53 = vpop.eup %874 }
 0x342   :  { %v355_v31 = vpop.f32.mrb[4].mxu1 }
 0x343   :  { %v360_v32 = vmul.f32 %v359_v3, %v355_v31  ;;  %v821_v33 = vpop.f32.mrb[5].mxu1 }
 0x345   :  { %838 = vmatpush3.msra.mxu1 %v360_v32 }
 0x346   :  { %840 = vmatmul.mubr.msk.f32.vlgmr.msra.gmra.mrb[8].mxu1 %vm138_vm2, %v23_v11 }
 0x363   :  { %v556_v37 = vpop.f32.mrb[6].mxu1 }
 0x364   :  { %v564_v38 = vmul.f32 %v563_v36, %v556_v37  ;;  %v831_v39 = vpop.f32.mrb[7].mxu1 }
 0x366   :  { %v565_v41 = vmul.f32 %v871_v40, %v564_v38 }
 0x368   :  { %v566_v6 = vsel %vm138_vm2, %v565_v41, 0.0 }
 0x369   :  { %567 = vadd.xlane.f32.xlu1 %v566_v6 }
 0x3f6   :  { %v568_v42 = vpop.xlane.xlu1 %567 }
 0x3f7   :  { %833 = vmatpush3.msra.mxu0 %v568_v42 }
 0x3f8   :  { %835 = vmatmul.mubr.msk.f32.vlgmr.msra.gmra.mrb[4].mxu0 %vm138_vm2, %v23_v11 }
 0x419   :  { %v711_v43 = vpop.f32.mrb[8].mxu1 }
 0x41a   :  { %v841_v44 = vpop.f32.mrb[9].mxu1  ;;  %v723_v55 = vmul.f32 %v873_v49, %v711_v43 }
 0x4cb   :  { %v641_v50 = vpop.f32.mrb[4].mxu0 }
 0x4cc   :  { %v715_v51 = vmul.f32 0.5, %v641_v50  ;;  %v836_v52 = vpop.f32.mrb[5].mxu0 }
 0x4ce   :  { %v720_v54 = vmul.f32 %v875_v53, %v715_v51 }
 0x4d0   :  { %v724_v57 = vadd.f32 %v723_v55, %v720_v54 }
 0x4d2   :  { %v725_v58 = vmul.f32 %v724_v57, %v24_v56 }
 0x4d4   :  { %v727_v59 = vsel %vm726_vm8, %v725_v58, 0.0 }
 0x4d5   :  { %728 = vadd.xlane.f32.xlu1 %v727_v59 }
 0x562   :  { %v729_v60 = vpop.xlane.xlu1 %728 }
 0x563   :  { %v730_v61 = vrot.slane %v729_v60, 4 }
 0x565   :  { %v731_v62 = vadd.f32 %v730_v61, %v729_v60 }
 0x567   :  { %v732_v63 = vrot.slane %v731_v62, 2 }
 0x569   :  { %v733_v0 = vadd.f32 %v732_v63, %v731_v62 }
 0x56b   :  { %v734_v1 = vrot.slane %v733_v0, 1 }
 0x56d   :  { %v735_v2 = vadd.f32 %v734_v1, %v733_v0 }
 0x56f   :  { %854 = vpush %v735_v2 }
 0x5a0   :  { %s855_s26 = spop %854 }
 0x5a1   :  { %738 = sst [smem:[#allocation2]] %s855_s26 }
 0x5a2   :  { %885 = shalt.err (!%p882_p2)
}
 0x5a3   :  { %s891_s7 = smov [#allocation2]  }
 0x5a4   :  { %746 = dma.smem_to_hbm %s891_s7, 16, %s1020_s4, [#allocation3]  }
 0x5a5   :  { %886 = dma.done.wait [#allocation3], 16  }
 0x5a6   :  { %887 = vsyncadd [#allocation3], 4294967280 }
 0x5a7   :  { %750 = sfence }
 0x5a8   :  { %751 = vsyncpa [#allocation3], 1 }

</bundles_post_ra>
